<compile_context>
chip_gen: v7x
topology: tpu7x:2x2x1
jax: 0.10.0
libtpu: 0.0.40
codegen_flags: <defaults>
</compile_context>

<pallas_src>
import jax
import jax.numpy as jnp
from jax.experimental import pallas as pl
from jax.experimental.pallas import tpu as pltpu

LN_EPS = 1e-5


def _round_up(x, m):
  return ((x + m - 1) // m) * m


def _round_down(x, m):
  return (x // m) * m


def adapter_kernel(x_ref, gbb_ref, wd_ref, bd_ref, wu_ref, o_ref):
  """One (tn, D) token tile. scale is pre-folded into wu/bu by the wrapper."""
  x = x_ref[...].astype(jnp.float32)              # residual / LN input (tn, D)

  # --- LayerNorm over the feature (lane) dim, f32 math on every chip -------
  mean = jnp.mean(x, axis=-1, keepdims=True)
  cen = x - mean
  var = jnp.mean(cen * cen, axis=-1, keepdims=True)
  xn = cen * jax.lax.rsqrt(var + LN_EPS)
  xn = xn * gbb_ref[0:1, :] + gbb_ref[1:2, :]     # gamma / beta

  # --- down_proj + ReLU (MXU) ----------------------------------------------
  down = jnp.dot(xn, wd_ref[...], preferred_element_type=jnp.float32)
  down = jnp.maximum(down + bd_ref[...], 0.0)     # (tn, Bp), lane-dense Bp
  # dropout with p=0.0 (eval) is the identity -> nothing to do.

  # --- up_proj (+ folded scale/bias) + residual ----------------------------
  up = jnp.dot(down, wu_ref[...], preferred_element_type=jnp.float32)
  up = up + gbb_ref[2:3, :]                       # scale-folded up-proj bias
  o_ref[...] = (up + x).astype(o_ref.dtype)


def prepare_params(params, *, scale=1.0, lane=128):
  """One-time weight prep: transpose, lane-pad the bottleneck, fold scale.

  Weights are kept f32 for strict parity with the PyTorch module; storing
  Wd^T/Wu^T in bf16 would halve resident weight VMEM if parity is relaxed.
  """
  d_model = params["ln_gamma"].shape[-1]
  down_w = params["down_w"].astype(jnp.float32)       # (B, D)
  up_w = params["up_w"].astype(jnp.float32)           # (D, B)
  bott = down_w.shape[0]
  bott_pad = _round_up(bott, lane)
  scale = float(scale)

  wd_t = jnp.pad(down_w.T, ((0, 0), (0, bott_pad - bott)))            # (D, Bp)
  bd = jnp.pad(params["down_b"].astype(jnp.float32).reshape(1, -1),
               ((0, 0), (0, bott_pad - bott)))                        # (1, Bp)
  wu_t = jnp.pad(up_w.T, ((0, bott_pad - bott), (0, 0))) * scale      # (Bp, D)
  bu = params["up_b"].astype(jnp.float32) * scale

  gbb = jnp.stack([params["ln_gamma"].astype(jnp.float32),
                   params["ln_beta"].astype(jnp.float32),
                   bu], axis=0)                                       # (3, D)
  return {"gbb": gbb, "wd_t": wd_t, "bd": bd, "wu_t": wu_t,
          "d_model": d_model, "bott_pad": bott_pad}


def _tpu_vmem_capacity_bytes():
  try:
    return int(pltpu.get_tpu_info().vmem_capacity_bytes)
  except Exception:
    return 64 << 20   # conservative default: v7x per-TC VMEM


def _preferred_dim_semantics():
  """On v7x, shard the independent token-tile axis across both TensorCores."""
  try:
    kind = jax.devices()[0].device_kind.lower()
  except Exception:
    kind = ""
  if ("v7" in kind or "tpu7" in kind) and hasattr(pltpu, "CORE_PARALLEL"):
    return (pltpu.CORE_PARALLEL,)
  return ("parallel",)


def adapter_forward(x, prepped, *, tn=None, max_tokens=2048):
  """x: (batch, seq, d_model). Returns same shape/dtype."""
  batch, seq, d_model = x.shape
  assert d_model == prepped["d_model"]
  bott_pad = prepped["bott_pad"]
  n = batch * seq
  itemsize = jnp.dtype(x.dtype).itemsize
  x_is_f32 = jnp.dtype(x.dtype) == jnp.dtype(jnp.float32)

  # ---- generation-gated VMEM budget (v5e/v6e: 128 MiB; v7x: 64 MiB/TC) ----
  vmem_cap = _tpu_vmem_capacity_bytes()
  if vmem_cap >= (100 << 20):
    budget, limit_cap = 96 << 20, 100 << 20
  else:
    budget, limit_cap = 44 << 20, 48 << 20

  # Resident weight / bias blocks, assuming single-buffering (pl.Buffered(1)).
  weight_bytes = 4 * (3 * d_model + d_model * bott_pad + bott_pad
                      + bott_pad * d_model)

  # Per-token-row VMEM bytes: double-buffered in+out tiles plus in-kernel f32
  # temporaries (x cast for non-f32 inputs, xn, up ~ D each; down ~ Bp) with
  # slack for compiler-managed layout copies.
  temp_floats_per_row = (4 if x_is_f32 else 5) * d_model + 2 * bott_pad
  per_row = 2 * 2 * d_model * itemsize + 4 * temp_floats_per_row

  if tn is None:
    # Direct solve for the largest legal token tile (no halving loop).
    avail = budget - weight_bytes - (2 << 20)
    tn = max(8, avail // per_row)
    tn = min(int(tn), int(max_tokens), _round_up(n, 8))
    tn = _round_down(tn, 128) if tn >= 256 else _round_down(tn, 8)
  tn = max(8, _round_up(int(tn), 8))

  # vmem_limit sized for the worst fallback (double-buffered weights).
  vmem_limit = int(min(limit_cap,
                       max(32 << 20,
                           tn * per_row + 2 * weight_bytes + (4 << 20))))

  x2 = x.reshape(n, d_model)
  grid = (pl.cdiv(n, tn),)   # partial last tile: Pallas masks the OOB rows

  def build(dim_semantics, weight_buffers):
    if weight_buffers == 1 and hasattr(pl, "Buffered"):
      const_kw = dict(pipeline_mode=pl.Buffered(1))   # grid-invariant blocks
    else:
      const_kw = {}
    return pl.pallas_call(
        adapter_kernel,
        out_shape=jax.ShapeDtypeStruct((n, d_model), x.dtype),
        grid_spec=pltpu.PrefetchScalarGridSpec(
            num_scalar_prefetch=0,
            grid=grid,
            in_specs=[
                pl.BlockSpec((tn, d_model), lambda i: (i, 0)),       # x tile
                pl.BlockSpec((3, d_model), lambda i: (0, 0), **const_kw),
                pl.BlockSpec((d_model, bott_pad), lambda i: (0, 0), **const_kw),
                pl.BlockSpec((1, bott_pad), lambda i: (0, 0), **const_kw),
                pl.BlockSpec((bott_pad, d_model), lambda i: (0, 0), **const_kw),
            ],
            out_specs=pl.BlockSpec((tn, d_model), lambda i: (i, 0)),
        ),
        compiler_params=pltpu.CompilerParams(
            dimension_semantics=dim_semantics,
            vmem_limit_bytes=vmem_limit),
    )

  preferred = _preferred_dim_semantics()
  configs = [(preferred, 1)]
  if preferred != ("parallel",):
    configs.append((("parallel",), 1))
  configs.append((("parallel",), 2))   # most conservative, always-works config

  out, last_err = None, None
  for sems, wbufs in configs:
    try:
      out = build(sems, wbufs)(x2, prepped["gbb"], prepped["wd_t"],
                               prepped["bd"], prepped["wu_t"])
      break
    except Exception as e:                 # fall back to a safer config
      last_err = e
      out = None
  if out is None:
    raise last_err

  return out.reshape(batch, seq, d_model)


def reference_forward(x, params, *, scale=1.0):
  """Pure-JAX reference (matches the PyTorch forward)."""
  residual = x
  mean = jnp.mean(x, axis=-1, keepdims=True)
  var = jnp.mean((x - mean) ** 2, axis=-1, keepdims=True)
  xn = (x - mean) / jnp.sqrt(var + LN_EPS)
  xn = xn * params["ln_gamma"] + params["ln_beta"]
  down = jnp.maximum(xn @ params["down_w"].T + params["down_b"], 0.0)
  up = down @ params["up_w"].T + params["up_b"]
  up = up * scale
  return up + residual


if __name__ == "__main__":
  d_model = 32
  bottleneck = 64   # module hard-codes down_proj out-features = 64
  batch, seq = 2, 8
  scale = 1.0

  key = jax.random.PRNGKey(0)
  kx, kg, kb, kd, kdb, ku, kub = jax.random.split(key, 7)

  x = jax.random.normal(kx, (batch, seq, d_model), dtype=jnp.float32)

  params = {
      "ln_gamma": 1.0 + 0.1 * jax.random.normal(kg, (d_model,), jnp.float32),
      "ln_beta": 0.1 * jax.random.normal(kb, (d_model,), jnp.float32),
      # down_proj: nn.Linear(d_model, 64) -> weight (64, d_model)
      "down_w": 0.1 * jax.random.normal(kd, (bottleneck, d_model), jnp.float32),
      "down_b": 0.05 * jax.random.normal(kdb, (bottleneck,), jnp.float32),
      # up_proj: nn.Linear(bottleneck, d_model) -> weight (d_model, bottleneck)
      "up_w": 0.1 * jax.random.normal(ku, (d_model, bottleneck), jnp.float32),
      "up_b": 0.05 * jax.random.normal(kub, (d_model,), jnp.float32),
  }

  prepped = prepare_params(params, scale=scale)

  # Multi-step grid (tn=8 -> grid=(2,)) exercises the pipelined path.
  out = jax.block_until_ready(adapter_forward(x, prepped, tn=8))
  ref = reference_forward(x, params, scale=scale)
  assert out.shape == x.shape
  assert jnp.allclose(out, ref, atol=1e-5, rtol=1e-5), "mismatch vs reference"

  # Ragged token count (n=10, tn=8): exercises the masked partial-tile path
  # (no host-side pad/slice copies).
  x_r = jax.random.normal(kx, (2, 5, d_model), dtype=jnp.float32)
  out_r = jax.block_until_ready(adapter_forward(x_r, prepped, tn=8))
  ref_r = reference_forward(x_r, params, scale=scale)
  assert out_r.shape == x_r.shape
  assert jnp.allclose(out_r, ref_r, atol=1e-5, rtol=1e-5), "ragged mismatch"

  # Auto tile-size path (direct VMEM solve).
  out_a = jax.block_until_ready(adapter_forward(x, prepped))
  assert jnp.allclose(out_a, ref, atol=1e-5, rtol=1e-5), "auto-tile mismatch"

  print("KERNEL_OK")
</pallas_src>

<mosaic_0001>
module attributes {stable_mosaic.version = 11 : i64} {
  func.func @adapter_kernel(%arg0: i32, %arg1: memref<8x32xf32, #tpu.memory_space<vmem>>, %arg2: memref<3x32xf32, #tpu.memory_space<vmem>>, %arg3: memref<32x128xf32, #tpu.memory_space<vmem>>, %arg4: memref<1x128xf32, #tpu.memory_space<vmem>>, %arg5: memref<128x32xf32, #tpu.memory_space<vmem>>, %arg6: memref<8x32xf32, #tpu.memory_space<vmem>>) attributes {dimension_semantics = [#tpu.dimension_semantics<parallel>], iteration_bounds = array<i64: 2>, scalar_prefetch = 0 : i64, scratch_operands = 0 : i64, tpu.core_type = #tpu.core_type<tc>, window_params = [{transform_indices = @transform_0, window_bounds = array<i64: 8, 32>}, {pipeline_mode = #tpu.pipeline_mode<synchronous>, transform_indices = @transform_1, window_bounds = array<i64: 3, 32>}, {pipeline_mode = #tpu.pipeline_mode<synchronous>, transform_indices = @transform_2, window_bounds = array<i64: 32, 128>}, {pipeline_mode = #tpu.pipeline_mode<synchronous>, transform_indices = @transform_3, window_bounds = array<i64: 1, 128>}, {pipeline_mode = #tpu.pipeline_mode<synchronous>, transform_indices = @transform_4, window_bounds = array<i64: 128, 32>}, {transform_indices = @transform_5, window_bounds = array<i64: 8, 32>}]} {
    %c0 = arith.constant 0 : index
    %c0_0 = arith.constant 0 : index
    %0 = vector.load %arg1[%c0, %c0_0] : memref<8x32xf32, #tpu.memory_space<vmem>>, vector<8x32xf32>
    %cst = arith.constant dense<0.000000e+00> : vector<8xf32>
    %1 = vector.multi_reduction <add>, %0, %cst [1] : vector<8x32xf32> to vector<8xf32>
    %2 = vector.shape_cast %1 : vector<8xf32> to vector<8x1xf32>
    %cst_1 = arith.constant 3.200000e+01 : f32
    %3 = vector.broadcast %cst_1 : f32 to vector<8x1xf32>
    %4 = arith.divf %2, %3 : vector<8x1xf32>
    %5 = vector.broadcast %4 : vector<8x1xf32> to vector<8x32xf32>
    %6 = arith.subf %0, %5 : vector<8x32xf32>
    %7 = arith.mulf %6, %6 : vector<8x32xf32>
    %cst_2 = arith.constant dense<0.000000e+00> : vector<8xf32>
    %8 = vector.multi_reduction <add>, %7, %cst_2 [1] : vector<8x32xf32> to vector<8xf32>
    %9 = vector.shape_cast %8 : vector<8xf32> to vector<8x1xf32>
    %cst_3 = arith.constant 3.200000e+01 : f32
    %10 = vector.broadcast %cst_3 : f32 to vector<8x1xf32>
    %11 = arith.divf %9, %10 : vector<8x1xf32>
    %cst_4 = arith.constant 9.99999974E-6 : f32
    %12 = vector.broadcast %cst_4 : f32 to vector<8x1xf32>
    %13 = arith.addf %11, %12 : vector<8x1xf32>
    %14 = math.rsqrt %13 : vector<8x1xf32>
    %15 = vector.broadcast %14 : vector<8x1xf32> to vector<8x32xf32>
    %16 = arith.mulf %6, %15 : vector<8x32xf32>
    %c0_5 = arith.constant 0 : index
    %c0_6 = arith.constant 0 : index
    %17 = vector.load %arg2[%c0_5, %c0_6] : memref<3x32xf32, #tpu.memory_space<vmem>>, vector<1x32xf32>
    %18 = vector.broadcast %17 : vector<1x32xf32> to vector<8x32xf32>
    %19 = arith.mulf %16, %18 : vector<8x32xf32>
    %c1 = arith.constant 1 : index
    %c0_7 = arith.constant 0 : index
    %20 = vector.load %arg2[%c1, %c0_7] : memref<3x32xf32, #tpu.memory_space<vmem>>, vector<1x32xf32>
    %21 = vector.broadcast %20 : vector<1x32xf32> to vector<8x32xf32>
    %22 = arith.addf %19, %21 : vector<8x32xf32>
    %c0_8 = arith.constant 0 : index
    %c0_9 = arith.constant 0 : index
    %23 = vector.load %arg3[%c0_8, %c0_9] : memref<32x128xf32, #tpu.memory_space<vmem>>, vector<32x128xf32>
    %cst_10 = arith.constant dense<0.000000e+00> : vector<8x128xf32>
    %24 = tpu.matmul %22, %23, %cst_10 {dimension_numbers = #tpu.dot_dimension_numbers<[1], [0], [0], [1], [0, 0, 1, 1], [], []>} : vector<8x32xf32>, vector<32x128xf32>, vector<8x128xf32> -> vector<8x128xf32>
    %c0_11 = arith.constant 0 : index
    %c0_12 = arith.constant 0 : index
    %25 = vector.load %arg4[%c0_11, %c0_12] : memref<1x128xf32, #tpu.memory_space<vmem>>, vector<1x128xf32>
    %26 = vector.broadcast %25 : vector<1x128xf32> to vector<8x128xf32>
    %27 = arith.addf %24, %26 : vector<8x128xf32>
    %cst_13 = arith.constant 0.000000e+00 : f32
    %28 = vector.broadcast %cst_13 : f32 to vector<8x128xf32>
    %29 = arith.maximumf %27, %28 : vector<8x128xf32>
    %c0_14 = arith.constant 0 : index
    %c0_15 = arith.constant 0 : index
    %30 = vector.load %arg5[%c0_14, %c0_15] : memref<128x32xf32, #tpu.memory_space<vmem>>, vector<128x32xf32>
    %cst_16 = arith.constant dense<0.000000e+00> : vector<8x32xf32>
    %31 = tpu.matmul %29, %30, %cst_16 {dimension_numbers = #tpu.dot_dimension_numbers<[1], [0], [0], [1], [0, 0, 1, 1], [], []>} : vector<8x128xf32>, vector<128x32xf32>, vector<8x32xf32> -> vector<8x32xf32>
    %c2 = arith.constant 2 : index
    %c0_17 = arith.constant 0 : index
    %32 = vector.load %arg2[%c2, %c0_17] : memref<3x32xf32, #tpu.memory_space<vmem>>, vector<1x32xf32>
    %33 = vector.broadcast %32 : vector<1x32xf32> to vector<8x32xf32>
    %34 = arith.addf %31, %33 : vector<8x32xf32>
    %35 = arith.addf %34, %0 : vector<8x32xf32>
    %c0_18 = arith.constant 0 : index
    %c0_19 = arith.constant 0 : index
    %36 = vector.load %arg6[%c0_18, %c0_19] : memref<8x32xf32, #tpu.memory_space<vmem>>, vector<8x32xf32>
    tpu.vector_store %arg6[%c0_18, %c0_19], %35 {strides = array<i32>} : memref<8x32xf32, #tpu.memory_space<vmem>>, vector<8x32xf32>,
    return
  }
  func.func @transform_0(%arg0: i32) -> (i32, i32) {
    %c0_i32 = arith.constant 0 : i32
    %c0_i32_0 = arith.constant 0 : i32
    return %arg0, %c0_i32 : i32, i32
  }
  func.func @transform_1(%arg0: i32) -> (i32, i32) {
    %c0_i32 = arith.constant 0 : i32
    %c0_i32_0 = arith.constant 0 : i32
    %c0_i32_1 = arith.constant 0 : i32
    return %c0_i32, %c0_i32_0 : i32, i32
  }
  func.func @transform_2(%arg0: i32) -> (i32, i32) {
    %c0_i32 = arith.constant 0 : i32
    %c0_i32_0 = arith.constant 0 : i32
    %c0_i32_1 = arith.constant 0 : i32
    return %c0_i32, %c0_i32_0 : i32, i32
  }
  func.func @transform_3(%arg0: i32) -> (i32, i32) {
    %c0_i32 = arith.constant 0 : i32
    %c0_i32_0 = arith.constant 0 : i32
    %c0_i32_1 = arith.constant 0 : i32
    return %c0_i32, %c0_i32_0 : i32, i32
  }
  func.func @transform_4(%arg0: i32) -> (i32, i32) {
    %c0_i32 = arith.constant 0 : i32
    %c0_i32_0 = arith.constant 0 : i32
    %c0_i32_1 = arith.constant 0 : i32
    return %c0_i32, %c0_i32_0 : i32, i32
  }
  func.func @transform_5(%arg0: i32) -> (i32, i32) {
    %c0_i32 = arith.constant 0 : i32
    %c0_i32_0 = arith.constant 0 : i32
    return %arg0, %c0_i32 : i32, i32
  }
}

module attributes {stable_mosaic.version = 11 : i64} {
  func.func @adapter_kernel(%arg0: i32, %arg1: memref<8x32xf32, #tpu.memory_space<vmem>>, %arg2: memref<3x32xf32, #tpu.memory_space<vmem>>, %arg3: memref<32x128xf32, #tpu.memory_space<vmem>>, %arg4: memref<1x128xf32, #tpu.memory_space<vmem>>, %arg5: memref<128x32xf32, #tpu.memory_space<vmem>>, %arg6: memref<8x32xf32, #tpu.memory_space<vmem>>) attributes {dimension_semantics = [#tpu.dimension_semantics<parallel>], iteration_bounds = array<i64: 2>, scalar_prefetch = 0 : i64, scratch_operands = 0 : i64, tpu.core_type = #tpu.core_type<tc>, window_params = [{transform_indices = @transform_0, window_bounds = array<i64: 8, 32>}, {pipeline_mode = #tpu.pipeline_mode<synchronous>, transform_indices = @transform_1, window_bounds = array<i64: 3, 32>}, {pipeline_mode = #tpu.pipeline_mode<synchronous>, transform_indices = @transform_2, window_bounds = array<i64: 32, 128>}, {pipeline_mode = #tpu.pipeline_mode<synchronous>, transform_indices = @transform_3, window_bounds = array<i64: 1, 128>}, {pipeline_mode = #tpu.pipeline_mode<synchronous>, transform_indices = @transform_4, window_bounds = array<i64: 128, 32>}, {transform_indices = @transform_5, window_bounds = array<i64: 8, 32>}]} {
    %c0 = arith.constant 0 : index
    %c0_0 = arith.constant 0 : index
    %0 = vector.load %arg1[%c0, %c0_0] : memref<8x32xf32, #tpu.memory_space<vmem>>, vector<8x32xf32>
    %cst = arith.constant dense<0.000000e+00> : vector<8xf32>
    %1 = vector.multi_reduction <add>, %0, %cst [1] : vector<8x32xf32> to vector<8xf32>
    %2 = vector.shape_cast %1 : vector<8xf32> to vector<8x1xf32>
    %cst_1 = arith.constant 3.200000e+01 : f32
    %3 = vector.broadcast %cst_1 : f32 to vector<8x1xf32>
    %4 = arith.divf %2, %3 : vector<8x1xf32>
    %5 = vector.broadcast %4 : vector<8x1xf32> to vector<8x32xf32>
    %6 = arith.subf %0, %5 : vector<8x32xf32>
    %7 = arith.mulf %6, %6 : vector<8x32xf32>
    %cst_2 = arith.constant dense<0.000000e+00> : vector<8xf32>
    %8 = vector.multi_reduction <add>, %7, %cst_2 [1] : vector<8x32xf32> to vector<8xf32>
    %9 = vector.shape_cast %8 : vector<8xf32> to vector<8x1xf32>
    %cst_3 = arith.constant 3.200000e+01 : f32
    %10 = vector.broadcast %cst_3 : f32 to vector<8x1xf32>
    %11 = arith.divf %9, %10 : vector<8x1xf32>
    %cst_4 = arith.constant 9.99999974E-6 : f32
    %12 = vector.broadcast %cst_4 : f32 to vector<8x1xf32>
    %13 = arith.addf %11, %12 : vector<8x1xf32>
    %14 = math.rsqrt %13 : vector<8x1xf32>
    %15 = vector.broadcast %14 : vector<8x1xf32> to vector<8x32xf32>
    %16 = arith.mulf %6, %15 : vector<8x32xf32>
    %c0_5 = arith.constant 0 : index
    %c0_6 = arith.constant 0 : index
    %17 = vector.load %arg2[%c0_5, %c0_6] : memref<3x32xf32, #tpu.memory_space<vmem>>, vector<1x32xf32>
    %18 = vector.broadcast %17 : vector<1x32xf32> to vector<8x32xf32>
    %19 = arith.mulf %16, %18 : vector<8x32xf32>
    %c1 = arith.constant 1 : index
    %c0_7 = arith.constant 0 : index
    %20 = vector.load %arg2[%c1, %c0_7] : memref<3x32xf32, #tpu.memory_space<vmem>>, vector<1x32xf32>
    %21 = vector.broadcast %20 : vector<1x32xf32> to vector<8x32xf32>
    %22 = arith.addf %19, %21 : vector<8x32xf32>
    %c0_8 = arith.constant 0 : index
    %c0_9 = arith.constant 0 : index
    %23 = vector.load %arg3[%c0_8, %c0_9] : memref<32x128xf32, #tpu.memory_space<vmem>>, vector<32x128xf32>
    %cst_10 = arith.constant dense<0.000000e+00> : vector<8x128xf32>
    %24 = tpu.matmul %22, %23, %cst_10 {dimension_numbers = #tpu.dot_dimension_numbers<[1], [0], [0], [1], [0, 0, 1, 1], [], []>} : vector<8x32xf32>, vector<32x128xf32>, vector<8x128xf32> -> vector<8x128xf32>
    %c0_11 = arith.constant 0 : index
    %c0_12 = arith.constant 0 : index
    %25 = vector.load %arg4[%c0_11, %c0_12] : memref<1x128xf32, #tpu.memory_space<vmem>>, vector<1x128xf32>
    %26 = vector.broadcast %25 : vector<1x128xf32> to vector<8x128xf32>
    %27 = arith.addf %24, %26 : vector<8x128xf32>
    %cst_13 = arith.constant 0.000000e+00 : f32
    %28 = vector.broadcast %cst_13 : f32 to vector<8x128xf32>
    %29 = arith.maximumf %27, %28 : vector<8x128xf32>
    %c0_14 = arith.constant 0 : index
    %c0_15 = arith.constant 0 : index
    %30 = vector.load %arg5[%c0_14, %c0_15] : memref<128x32xf32, #tpu.memory_space<vmem>>, vector<128x32xf32>
    %cst_16 = arith.constant dense<0.000000e+00> : vector<8x32xf32>
    %31 = tpu.matmul %29, %30, %cst_16 {dimension_numbers = #tpu.dot_dimension_numbers<[1], [0], [0], [1], [0, 0, 1, 1], [], []>} : vector<8x128xf32>, vector<128x32xf32>, vector<8x32xf32> -> vector<8x32xf32>
    %c2 = arith.constant 2 : index
    %c0_17 = arith.constant 0 : index
    %32 = vector.load %arg2[%c2, %c0_17] : memref<3x32xf32, #tpu.memory_space<vmem>>, vector<1x32xf32>
    %33 = vector.broadcast %32 : vector<1x32xf32> to vector<8x32xf32>
    %34 = arith.addf %31, %33 : vector<8x32xf32>
    %35 = arith.addf %34, %0 : vector<8x32xf32>
    %c0_18 = arith.constant 0 : index
    %c0_19 = arith.constant 0 : index
    %36 = vector.load %arg6[%c0_18, %c0_19] : memref<8x32xf32, #tpu.memory_space<vmem>>, vector<8x32xf32>
    tpu.vector_store %arg6[%c0_18, %c0_19], %35 {strides = array<i32>} : memref<8x32xf32, #tpu.memory_space<vmem>>, vector<8x32xf32>,
    return
  }
  func.func @transform_0(%arg0: i32) -> (i32, i32) {
    %c0_i32 = arith.constant 0 : i32
    %c0_i32_0 = arith.constant 0 : i32
    return %arg0, %c0_i32 : i32, i32
  }
  func.func @transform_1(%arg0: i32) -> (i32, i32) {
    %c0_i32 = arith.constant 0 : i32
    %c0_i32_0 = arith.constant 0 : i32
    %c0_i32_1 = arith.constant 0 : i32
    return %c0_i32, %c0_i32_0 : i32, i32
  }
  func.func @transform_2(%arg0: i32) -> (i32, i32) {
    %c0_i32 = arith.constant 0 : i32
    %c0_i32_0 = arith.constant 0 : i32
    %c0_i32_1 = arith.constant 0 : i32
    return %c0_i32, %c0_i32_0 : i32, i32
  }
  func.func @transform_3(%arg0: i32) -> (i32, i32) {
    %c0_i32 = arith.constant 0 : i32
    %c0_i32_0 = arith.constant 0 : i32
    %c0_i32_1 = arith.constant 0 : i32
    return %c0_i32, %c0_i32_0 : i32, i32
  }
  func.func @transform_4(%arg0: i32) -> (i32, i32) {
    %c0_i32 = arith.constant 0 : i32
    %c0_i32_0 = arith.constant 0 : i32
    %c0_i32_1 = arith.constant 0 : i32
    return %c0_i32, %c0_i32_0 : i32, i32
  }
  func.func @transform_5(%arg0: i32) -> (i32, i32) {
    %c0_i32 = arith.constant 0 : i32
    %c0_i32_0 = arith.constant 0 : i32
    return %arg0, %c0_i32 : i32, i32
  }
}

</mosaic_0001>

<bundles_post_ra>
// kernel: tpu_custom_call.1
= control target key start
LH: loop header
LB: loop body
LE: loop exit
PB: predicated region body
PF: predicated region fallthrough
CT: control target
= control target key end

     0   :  { %10 = vsyncpa [#allocation3], 0  ;;  %s935_s0 = inlined_call_operand.vmem [shape: f32[16,32], index: 0, kind: input, shape index: {}]   ;;  %s936_s1 = inlined_call_operand.vmem [shape: f32[3,32], index: 1, kind: input, shape index: {}]   ;;  %s937_s2 = inlined_call_operand.vmem [shape: f32[32,128], index: 2, kind: input, shape index: {}]   ;;  %s938_s3 = inlined_call_operand.vmem [shape: f32[1,128], index: 3, kind: input, shape index: {}]   ;;  %s939_s4 = inlined_call_operand.vmem [shape: f32[128,32], index: 4, kind: input, shape index: {}]   ;;  %s940_s5 = inlined_call_operand.hbm [shape: f32[16,32], index: 5, kind: output, shape index: {}]  }
   0x1   :  { %12 = vsyncpa [#allocation3 + $0x1], 0  ;;  %s754_s18 = smov 0   ;;  %s756_s19 = smov 0  }
   0x2   :  { %s758_s20 = smov 0   ;;  %s760_s21 = smov 0  }
   0x3 LB: > { %s775_s22 = sadd.s32 4294967295, %s718_s21   ;;  %s499_s23 = sadd.s32 4294967294, %s718_s21   ;;  %s718_s21 = sphi %s760_s21, %s946_s21   ;;  %s714_s20 = sphi %s758_s20, %s945_s20   ;;  %s710_s19 = sphi %s756_s19, %s944_s19   ;;  %s706_s18 = sphi %s754_s18, %s943_s18  }
   0x4   : > { %s779_s24 = sadd.s32 1, %s718_s21   ;;  %s135_s25 = sadd.s32 1, %s714_s20 }
   0x5   : > { %s132_s26 = ssub.s32 %s718_s21, %s779_s24  ;;  %p145_p0 = scmp.ne.s32.totalorder %s714_s20, %s710_s19 }
   0x6   : > { %p133_p1 = scmp.eq.s32.totalorder %s132_s26, 0  ;;  %p146_p2 = scmp.eq.s32.totalorder %s775_s22, 1 }
   0x7   : > { %p151_p3 = scmp.ne.s32.totalorder %s710_s19, %s706_s18  ;;  %p152_p4 = scmp.eq.s32.totalorder %s499_s23, 1 }
   0x8   : > { %s790_s27 = scalar_select %p133_p1, %s714_s20, %s135_s25  }
   0x9   : > { %p792_p5 = por %p146_p2, %p145_p0  ;;  %p796_p6 = por %p152_p4, %p151_p3 }
   0xa   : > { %p502_p7 = scmp.ge.s32.totalorder %s718_s21, 1  ;;  %p189_p8 = scmp.lt.s32.totalorder %s718_s21, 3 }
   0xc   : > { %p190_p9 = pnand %p502_p7, %p189_p8 }
   0xd   : > { %p216_p10 = scmp.lt.s32.totalorder (!%p190_p9), %s775_s22, 1  ;;  %vm221_vm0 = vcmask (!%p190_p9), 261120   ;;  %v248_v7 = vld [vmem:[%s937_s2] sm:$0xff] (!%p190_p9)  ;;  %v249_v8 = vld [vmem:[%s937_s2 + $0x8] sm:$0xff] (!%p190_p9)  ;;  %v250_v9 = vld [vmem:[%s937_s2 + $0x10] sm:$0xff] (!%p190_p9)  ;;  %v720_v10 = vmov (!%p190_p9), 0.0|0.0  }
   0xe   : > { %193 = sbr.rel (%p190_p9) target bundleno = 785 (0x311), region = 40  ;;  %582 = vmatprep.subr.bf16.mxu0 (!%p190_p9), %v720_v10  ;;  %v583_v11 = vpack.c.bf16 (!%p190_p9), %v249_v8, %v248_v7  ;;  %v251_v12 = vld [vmem:[%s937_s2 + $0x18] sm:$0xff] (!%p190_p9)  ;;  %vm721_vm1 = vmmov (!%p190_p9), 0   ;;  %v722_v13 = vmov (!%p190_p9), 0.0   ;;  %588 = vmatprep.subr.bf16.mxu1 (!%p190_p9), %v720_v10  ;;  %v333_v15 = vld [vmem:[%s939_s4] sm:$0xff] (!%p190_p9)  ;;  %v334_v16 = vld [vmem:[%s939_s4 + $0x8] sm:$0xff] (!%p190_p9) }
   0xf   : > { %544 = vmatprep.mubr.msk.f32.mxu0 (!%p190_p9), %vm721_vm1, %v722_v13  ;;  %579 = vmatprep.mubr.msk.f32.mxu1 (!%p190_p9), %vm721_vm1, %v722_v13  ;;  %v586_v14 = vpack.c.bf16 (!%p190_p9), %v251_v12, %v250_v9  ;;  %v335_v17 = vld [vmem:[%s939_s4 + $0x10] sm:$0xff] (!%p190_p9)  ;;  %v589_v18 = vpack.c.bf16 (!%p190_p9), %v334_v16, %v333_v15  ;;  %v336_v19 = vld [vmem:[%s939_s4 + $0x18] sm:$0xff] (!%p190_p9)  ;;  %v337_v21 = vld [vmem:[%s939_s4 + $0x20] sm:$0xff] (!%p190_p9)  ;;  %s213_s8 = sand.u32 (!%p190_p9), 1, %s710_s19   ;;  %s511_s12 = sshll.u32 (!%p190_p9), %s775_s22, 7 }
  0x10   : > { %584 = vmatpush3.bf16.msra.mxu0 (!%p190_p9), %v583_v11  ;;  %v592_v20 = vpack.c.bf16 (!%p190_p9), %v336_v19, %v335_v17  ;;  %v338_v22 = vld [vmem:[%s939_s4 + $0x28] sm:$0xff] (!%p190_p9)  ;;  %v339_v24 = vld [vmem:[%s939_s4 + $0x30] sm:$0xff] (!%p190_p9)  ;;  %v340_v25 = vld [vmem:[%s939_s4 + $0x38] sm:$0xff] (!%p190_p9)  ;;  %s892_s17 = scalar_lea.hbm (!%p190_p9), %s940_s5, %s511_s12  ;;  %s427_s23 = scalar_lea.sflag (!%p190_p9), [#allocation3], %s213_s8 }
  0x11   : > { %585 = vmatprep.subr.bf16.mxu0 (!%p190_p9), %v720_v10  ;;  %590 = vmatpush3.bf16.msra.mxu1 (!%p190_p9), %v589_v18  ;;  %v595_v23 = vpack.c.bf16 (!%p190_p9), %v338_v22, %v337_v21  ;;  %v598_v26 = vpack.c.bf16 (!%p190_p9), %v340_v25, %v339_v24  ;;  %v341_v27 = vld [vmem:[%s939_s4 + $0x40] sm:$0xff] (!%p190_p9)  ;;  %v342_v28 = vld [vmem:[%s939_s4 + $0x48] sm:$0xff] (!%p190_p9)  ;;  %v343_v30 = vld [vmem:[%s939_s4 + $0x50] sm:$0xff] (!%p190_p9)  ;;  %s723_s25 = smov (!%p190_p9), [#allocation2]  }
  0x12   : > { %591 = vmatprep.subr.bf16.mxu1 (!%p190_p9), %v720_v10  ;;  %v601_v29 = vpack.c.bf16 (!%p190_p9), %v342_v28, %v341_v27  ;;  %v344_v31 = vld [vmem:[%s939_s4 + $0x58] sm:$0xff] (!%p190_p9)  ;;  %v345_v33 = vld [vmem:[%s939_s4 + $0x60] sm:$0xff] (!%p190_p9)  ;;  %v346_v34 = vld [vmem:[%s939_s4 + $0x68] sm:$0xff] (!%p190_p9)  ;;  %s660_s26 = sshll.u32 (!%p190_p9), %s723_s25, 4  ;;  %s661_s26 = int_to_ptr.vmem [resolvable:$false] %s660_s26 }
  0x13   : > { %v604_v32 = vpack.c.bf16 (!%p190_p9), %v344_v31, %v343_v30  ;;  %v607_v35 = vpack.c.bf16 (!%p190_p9), %v346_v34, %v345_v33  ;;  %v505_v40 = vld [vmem:[%s936_s1] ss:$0 sm:$0xff] (!%p190_p9)  ;;  %v506_v42 = vld [vmem:[%s936_s1 + $0x1] ss:$0 sm:$0xff] (!%p190_p9)  ;;  %v347_v45 = vld [vmem:[%s939_s4 + $0x70] sm:$0xff] (!%p190_p9) }
  0x14   : > { %587 = vmatpush3.bf16.msra.mxu0 (!%p190_p9), %v586_v14  ;;  %v348_v46 = vld [vmem:[%s939_s4 + $0x78] sm:$0xff] (!%p190_p9)  ;;  %v507_v48 = vld [vmem:[%s938_s3] ss:$0 sm:$0xff] (!%p190_p9)  ;;  %v509_v53 = vld [vmem:[%s936_s1 + $0x2] ss:$0 sm:$0xff] (!%p190_p9) }
  0x15   : > { %s217_s30 = scalar_select %p216_p10, %s775_s22, 1  ;;  %593 = vmatpush3.bf16.msra.mxu1 %v592_v20  ;;  %v610_v47 = vpack.c.bf16 %v348_v46, %v347_v45 }
  0x16   : > { %594 = vmatprep.subr.bf16.mxu1 %v720_v10 }
  0x17   : > { %s504_s6 = sshll.u32 %s217_s30, 3  ;;  %s662_s30 = scalar_lea.vmem %s661_s26, 256 }
  0x18   : > { %s219_s9 = scalar_lea.vmem %s935_s0, %s504_s6 }
  0x19   : > { %v807_v0 = vld [vmem:[%s219_s9] sm:$0xff]  ;;  %596 = vmatpush3.bf16.msra.mxu1 %v595_v23  ;;  %s503_s9 = sshll.u32 %s213_s8, 3 }
  0x1a   : > { %v222_v1 = vsel %vm221_vm0, %v807_v0, 0.0  ;;  %597 = vmatprep.subr.bf16.mxu1 %v720_v10  ;;  %s215_s13 = scalar_lea.vmem [#allocation2], %s503_s9 }
  0x1b   : > { %223 = vadd.xlane.f32.xlu0 %v222_v1  ;;  %s440_s14 = sshll.u32 %s215_s13, 4  ;;  %s894_s14 = int_to_ptr.vmem [resolvable:$true] %s440_s14 }
  0x1c   : > { %s656_s22 = scalar_lea.vmem %s894_s14, 128  ;;  %p663_p0 = scmp.lt.s32.totalorder %s894_s14, %s661_s26 }
  0x1d   : > { %599 = vmatpush3.bf16.msra.mxu1 %v598_v26  ;;  %p657_p11 = scmp.ne.s32.totalorder %s894_s14, %s656_s22  ;;  %p664_p1 = scmp.lt.s32.totalorder %s662_s30, %s656_s22 }
  0x1e   : > { %600 = vmatprep.subr.bf16.mxu1 %v720_v10 }
  0x1f   : > { %p658_p12 = pnand %p657_p11, %p792_p5  ;;  %p665_p2 = por %p664_p1, %p663_p0 }
  0x21   : > { %602 = vmatpush3.bf16.msra.mxu1 %v601_v29  ;;  %p659_p13 = pneg %p658_p12 }
  0x22   : > { %603 = vmatprep.subr.bf16.mxu1 %v720_v10 }
  0x23   : > { %p666_p3 = pnand %p665_p2, %p659_p13 }
  0x25   : > { %605 = vmatpush3.bf16.msra.mxu1 %v604_v32 }
  0x26   : > { %606 = vmatprep.subr.bf16.mxu1 %v720_v10 }
  0x29   : > { %608 = vmatpush3.bf16.msra.mxu1 %v607_v35 }
  0x2a   : > { %609 = vmatprep.subr.bf16.mxu1 %v720_v10 }
  0x2d   : > { %611 = vmatpush3.bf16.msra.mxu1 %v610_v47 }
  0xa8   : > { %v224_v2 = vpop.xlane.xlu0 %223 }
  0xa9   : > { %v226_v3 = vmul.f32 0.03125, %v224_v2 }
  0xab   : > { %v227_v4 = vsub.f32 %v807_v0, %v226_v3 }
  0xad   : > { %v228_v5 = vmul.f32 %v227_v4, %v227_v4 }
  0xaf   : > { %v229_v6 = vsel %vm221_vm0, %v228_v5, 0.0 }
  0xb0   : > { %230 = vadd.xlane.f32.xlu0 %v229_v6 }
 0x13d   : > { %v231_v36 = vpop.xlane.xlu0 %230 }
 0x13e   : > { %v232_v37 = vmul.f32 0.03125, %v231_v36 }
 0x140   : > { %v233_v38 = vadd.f32 1e-05, %v232_v37 }
 0x142   : > { %654 = vrsqrt.f32 %v233_v38 }
 0x14c   : > { %v655_v39 = vpop.eup %654 }
 0x14d   : > { %v235_v41 = vmul.f32 %v655_v39, %v227_v4 }
 0x14f   : > { %v241_v43 = vmul.f32 %v505_v40, %v235_v41 }
 0x151   : > { %v247_v44 = vadd.f32 %v506_v42, %v241_v43 }
 0x153   : > { %545 = vmatmul.mubr.msk.f32.vlgmr.msra.gmra.mrb[0].mxu0 %vm221_vm0, %v247_v44 }
 0x226   : > { %v328_v49 = vpop.f32.mrb[0].mxu0 }
 0x227   : > { %v329_v50 = vadd.f32 %v507_v48, %v328_v49  ;;  %v546_v51 = vpop.f32.mrb[1].mxu0 }
 0x229   : > { %v332_v52 = vmax.f32 %v329_v50, 0.0 }
 0x22b   : > { %580 = vmatmul.mubr.f32.vlgmr.msra.gmra.mrb[0].mxu1 %v332_v52 }
 0x2fe   : > { %v420_v54 = vpop.f32.mrb[0].mxu1 }
 0x2ff   : > { %v421_v55 = vadd.f32 %v509_v53, %v420_v54  ;;  %v581_v56 = vpop.f32.mrb[1].mxu1 }
 0x301   : > { %v424_v57 = vadd.f32 %v421_v55, %v807_v0 }
 0x303   : > { %425 = vst.msk [vmem:[%s215_s13] sm:$0xff] %vm221_vm0, %v424_v57 }
 0x304   : > { %669 = shalt.err (!%p666_p3)
}
 0x305   : > { %s670_s6 = scalar_lea.hbm %s892_s17, 128  ;;  %s674_s9 = scalar_lea.hbm %s940_s5, 256 }
 0x306   : > { %p671_p4 = scmp.ne.s32.totalorder %s892_s17, %s670_s6  ;;  %p675_p9 = scmp.lt.u32.totalorder %s892_s17, %s940_s5 }
 0x307   : > { %p676_p10 = scmp.lt.u32.totalorder %s674_s9, %s670_s6  ;;  %p678_p12 = scmp.lt.u32.totalorder %s670_s6, %s892_s17 }
 0x308   : > { %p672_p7 = pnand %p671_p4, %p792_p5 }
 0x309   : > { %p677_p11 = por %p676_p10, %p675_p9 }
 0x30a   : > { %p673_p8 = pneg %p672_p7 }
 0x30b   : > { %p679_p13 = por %p678_p12, %p677_p11 }
 0x30d   : > { %p680_p0 = pnand %p679_p13, %p673_p8 }
 0x30f   : > { %683 = shalt.err (!%p680_p0)
}
 0x310   : > { %612 = dma.vmem_to_hbm [thread:$0]  (%p792_p5), %s894_s14, 128, %s892_s17, %s427_s23  }
 0x311 PF: > { %p618_p1 = scmp.ge.s32.totalorder %s718_s21, 2  ;;  %s452_s12 = sand.u32 1, %s706_s18  }
 0x312   : > { %s453_s13 = scalar_lea.sflag [#allocation3], %s452_s12 }
 0x313   : > { %p615_p2 = pnand %p618_p1, %p796_p6 }
 0x315   : > { %701 = dma.done.wait (!%p615_p2), %s453_s13, 128  }
 0x316   : > { %703 = vsyncadd (!%p615_p2), %s453_s13, 4294967168  ;;  %p15_p3 = scmp.ge.s32.totalorder %s779_s24, 4   ;;  %s943_s18 = smov %s710_s19 }
 0x317   : > { %s944_s19 = smov %s714_s20  ;;  %s945_s20 = smov %s790_s27 }
 0x318   : > { %s946_s21 = smov %s779_s24  ;;  %17 = sbr.rel (!%p15_p3) target bundleno = 3 (0x3), region = 75 }
 0x31f   :  { %458 = vsyncpa [#allocation3], 1 }
 0x320   :  { %460 = vsyncpa [#allocation3 + $0x1], 1 }

// kernel: tpu_custom_call.1
= control target key start
LH: loop header
LB: loop body
LE: loop exit
PB: predicated region body
PF: predicated region fallthrough
CT: control target
= control target key end

     0   :  { %10 = vsyncpa [#allocation3], 0  ;;  %s935_s0 = inlined_call_operand.vmem [shape: f32[16,32], index: 0, kind: input, shape index: {}]   ;;  %s936_s1 = inlined_call_operand.vmem [shape: f32[3,32], index: 1, kind: input, shape index: {}]   ;;  %s937_s2 = inlined_call_operand.vmem [shape: f32[32,128], index: 2, kind: input, shape index: {}]   ;;  %s938_s3 = inlined_call_operand.vmem [shape: f32[1,128], index: 3, kind: input, shape index: {}]   ;;  %s939_s4 = inlined_call_operand.vmem [shape: f32[128,32], index: 4, kind: input, shape index: {}]   ;;  %s940_s5 = inlined_call_operand.hbm [shape: f32[16,32], index: 5, kind: output, shape index: {}]  }
   0x1   :  { %12 = vsyncpa [#allocation3 + $0x1], 0  ;;  %s754_s18 = smov 0   ;;  %s756_s19 = smov 0  }
   0x2   :  { %s758_s20 = smov 0   ;;  %s760_s21 = smov 0  }
   0x3 LB: > { %s775_s22 = sadd.s32 4294967295, %s718_s21   ;;  %s499_s23 = sadd.s32 4294967294, %s718_s21   ;;  %s718_s21 = sphi %s760_s21, %s946_s21   ;;  %s714_s20 = sphi %s758_s20, %s945_s20   ;;  %s710_s19 = sphi %s756_s19, %s944_s19   ;;  %s706_s18 = sphi %s754_s18, %s943_s18  }
   0x4   : > { %s779_s24 = sadd.s32 1, %s718_s21   ;;  %s135_s25 = sadd.s32 1, %s714_s20 }
   0x5   : > { %s132_s26 = ssub.s32 %s718_s21, %s779_s24  ;;  %p145_p0 = scmp.ne.s32.totalorder %s714_s20, %s710_s19 }
   0x6   : > { %p133_p1 = scmp.eq.s32.totalorder %s132_s26, 0  ;;  %p146_p2 = scmp.eq.s32.totalorder %s775_s22, 1 }
   0x7   : > { %p151_p3 = scmp.ne.s32.totalorder %s710_s19, %s706_s18  ;;  %p152_p4 = scmp.eq.s32.totalorder %s499_s23, 1 }
   0x8   : > { %s790_s27 = scalar_select %p133_p1, %s714_s20, %s135_s25  }
   0x9   : > { %p792_p5 = por %p146_p2, %p145_p0  ;;  %p796_p6 = por %p152_p4, %p151_p3 }
   0xa   : > { %p502_p7 = scmp.ge.s32.totalorder %s718_s21, 1  ;;  %p189_p8 = scmp.lt.s32.totalorder %s718_s21, 3 }
   0xc   : > { %p190_p9 = pnand %p502_p7, %p189_p8 }
   0xd   : > { %p216_p10 = scmp.lt.s32.totalorder (!%p190_p9), %s775_s22, 1  ;;  %vm221_vm0 = vcmask (!%p190_p9), 261120   ;;  %v248_v7 = vld [vmem:[%s937_s2] sm:$0xff] (!%p190_p9)  ;;  %v249_v8 = vld [vmem:[%s937_s2 + $0x8] sm:$0xff] (!%p190_p9)  ;;  %v250_v9 = vld [vmem:[%s937_s2 + $0x10] sm:$0xff] (!%p190_p9)  ;;  %v720_v10 = vmov (!%p190_p9), 0.0|0.0  }
   0xe   : > { %193 = sbr.rel (%p190_p9) target bundleno = 785 (0x311), region = 40  ;;  %582 = vmatprep.subr.bf16.mxu0 (!%p190_p9), %v720_v10  ;;  %v583_v11 = vpack.c.bf16 (!%p190_p9), %v249_v8, %v248_v7  ;;  %v251_v12 = vld [vmem:[%s937_s2 + $0x18] sm:$0xff] (!%p190_p9)  ;;  %vm721_vm1 = vmmov (!%p190_p9), 0   ;;  %v722_v13 = vmov (!%p190_p9), 0.0   ;;  %588 = vmatprep.subr.bf16.mxu1 (!%p190_p9), %v720_v10  ;;  %v333_v15 = vld [vmem:[%s939_s4] sm:$0xff] (!%p190_p9)  ;;  %v334_v16 = vld [vmem:[%s939_s4 + $0x8] sm:$0xff] (!%p190_p9) }
   0xf   : > { %544 = vmatprep.mubr.msk.f32.mxu0 (!%p190_p9), %vm721_vm1, %v722_v13  ;;  %579 = vmatprep.mubr.msk.f32.mxu1 (!%p190_p9), %vm721_vm1, %v722_v13  ;;  %v586_v14 = vpack.c.bf16 (!%p190_p9), %v251_v12, %v250_v9  ;;  %v335_v17 = vld [vmem:[%s939_s4 + $0x10] sm:$0xff] (!%p190_p9)  ;;  %v589_v18 = vpack.c.bf16 (!%p190_p9), %v334_v16, %v333_v15  ;;  %v336_v19 = vld [vmem:[%s939_s4 + $0x18] sm:$0xff] (!%p190_p9)  ;;  %v337_v21 = vld [vmem:[%s939_s4 + $0x20] sm:$0xff] (!%p190_p9)  ;;  %s213_s8 = sand.u32 (!%p190_p9), 1, %s710_s19   ;;  %s511_s12 = sshll.u32 (!%p190_p9), %s775_s22, 7 }
  0x10   : > { %584 = vmatpush3.bf16.msra.mxu0 (!%p190_p9), %v583_v11  ;;  %v592_v20 = vpack.c.bf16 (!%p190_p9), %v336_v19, %v335_v17  ;;  %v338_v22 = vld [vmem:[%s939_s4 + $0x28] sm:$0xff] (!%p190_p9)  ;;  %v339_v24 = vld [vmem:[%s939_s4 + $0x30] sm:$0xff] (!%p190_p9)  ;;  %v340_v25 = vld [vmem:[%s939_s4 + $0x38] sm:$0xff] (!%p190_p9)  ;;  %s892_s17 = scalar_lea.hbm (!%p190_p9), %s940_s5, %s511_s12  ;;  %s427_s23 = scalar_lea.sflag (!%p190_p9), [#allocation3], %s213_s8 }
  0x11   : > { %585 = vmatprep.subr.bf16.mxu0 (!%p190_p9), %v720_v10  ;;  %590 = vmatpush3.bf16.msra.mxu1 (!%p190_p9), %v589_v18  ;;  %v595_v23 = vpack.c.bf16 (!%p190_p9), %v338_v22, %v337_v21  ;;  %v598_v26 = vpack.c.bf16 (!%p190_p9), %v340_v25, %v339_v24  ;;  %v341_v27 = vld [vmem:[%s939_s4 + $0x40] sm:$0xff] (!%p190_p9)  ;;  %v342_v28 = vld [vmem:[%s939_s4 + $0x48] sm:$0xff] (!%p190_p9)  ;;  %v343_v30 = vld [vmem:[%s939_s4 + $0x50] sm:$0xff] (!%p190_p9)  ;;  %s723_s25 = smov (!%p190_p9), [#allocation2]  }
  0x12   : > { %591 = vmatprep.subr.bf16.mxu1 (!%p190_p9), %v720_v10  ;;  %v601_v29 = vpack.c.bf16 (!%p190_p9), %v342_v28, %v341_v27  ;;  %v344_v31 = vld [vmem:[%s939_s4 + $0x58] sm:$0xff] (!%p190_p9)  ;;  %v345_v33 = vld [vmem:[%s939_s4 + $0x60] sm:$0xff] (!%p190_p9)  ;;  %v346_v34 = vld [vmem:[%s939_s4 + $0x68] sm:$0xff] (!%p190_p9)  ;;  %s660_s26 = sshll.u32 (!%p190_p9), %s723_s25, 4  ;;  %s661_s26 = int_to_ptr.vmem [resolvable:$false] %s660_s26 }
  0x13   : > { %v604_v32 = vpack.c.bf16 (!%p190_p9), %v344_v31, %v343_v30  ;;  %v607_v35 = vpack.c.bf16 (!%p190_p9), %v346_v34, %v345_v33  ;;  %v505_v40 = vld [vmem:[%s936_s1] ss:$0 sm:$0xff] (!%p190_p9)  ;;  %v506_v42 = vld [vmem:[%s936_s1 + $0x1] ss:$0 sm:$0xff] (!%p190_p9)  ;;  %v347_v45 = vld [vmem:[%s939_s4 + $0x70] sm:$0xff] (!%p190_p9) }
  0x14   : > { %587 = vmatpush3.bf16.msra.mxu0 (!%p190_p9), %v586_v14  ;;  %v348_v46 = vld [vmem:[%s939_s4 + $0x78] sm:$0xff] (!%p190_p9)  ;;  %v507_v48 = vld [vmem:[%s938_s3] ss:$0 sm:$0xff] (!%p190_p9)  ;;  %v509_v53 = vld [vmem:[%s936_s1 + $0x2] ss:$0 sm:$0xff] (!%p190_p9) }
  0x15   : > { %s217_s30 = scalar_select %p216_p10, %s775_s22, 1  ;;  %593 = vmatpush3.bf16.msra.mxu1 %v592_v20  ;;  %v610_v47 = vpack.c.bf16 %v348_v46, %v347_v45 }
  0x16   : > { %594 = vmatprep.subr.bf16.mxu1 %v720_v10 }
  0x17   : > { %s504_s6 = sshll.u32 %s217_s30, 3  ;;  %s662_s30 = scalar_lea.vmem %s661_s26, 256 }
  0x18   : > { %s219_s9 = scalar_lea.vmem %s935_s0, %s504_s6 }
  0x19   : > { %v807_v0 = vld [vmem:[%s219_s9] sm:$0xff]  ;;  %596 = vmatpush3.bf16.msra.mxu1 %v595_v23  ;;  %s503_s9 = sshll.u32 %s213_s8, 3 }
  0x1a   : > { %v222_v1 = vsel %vm221_vm0, %v807_v0, 0.0  ;;  %597 = vmatprep.subr.bf16.mxu1 %v720_v10  ;;  %s215_s13 = scalar_lea.vmem [#allocation2], %s503_s9 }
  0x1b   : > { %223 = vadd.xlane.f32.xlu0 %v222_v1  ;;  %s440_s14 = sshll.u32 %s215_s13, 4  ;;  %s894_s14 = int_to_ptr.vmem [resolvable:$true] %s440_s14 }
  0x1c   : > { %s656_s22 = scalar_lea.vmem %s894_s14, 128  ;;  %p663_p0 = scmp.lt.s32.totalorder %s894_s14, %s661_s26 }
  0x1d   : > { %599 = vmatpush3.bf16.msra.mxu1 %v598_v26  ;;  %p657_p11 = scmp.ne.s32.totalorder %s894_s14, %s656_s22  ;;  %p664_p1 = scmp.lt.s32.totalorder %s662_s30, %s656_s22 }
  0x1e   : > { %600 = vmatprep.subr.bf16.mxu1 %v720_v10 }
  0x1f   : > { %p658_p12 = pnand %p657_p11, %p792_p5  ;;  %p665_p2 = por %p664_p1, %p663_p0 }
  0x21   : > { %602 = vmatpush3.bf16.msra.mxu1 %v601_v29  ;;  %p659_p13 = pneg %p658_p12 }
  0x22   : > { %603 = vmatprep.subr.bf16.mxu1 %v720_v10 }
  0x23   : > { %p666_p3 = pnand %p665_p2, %p659_p13 }
  0x25   : > { %605 = vmatpush3.bf16.msra.mxu1 %v604_v32 }
  0x26   : > { %606 = vmatprep.subr.bf16.mxu1 %v720_v10 }
  0x29   : > { %608 = vmatpush3.bf16.msra.mxu1 %v607_v35 }
  0x2a   : > { %609 = vmatprep.subr.bf16.mxu1 %v720_v10 }
  0x2d   : > { %611 = vmatpush3.bf16.msra.mxu1 %v610_v47 }
  0xa8   : > { %v224_v2 = vpop.xlane.xlu0 %223 }
  0xa9   : > { %v226_v3 = vmul.f32 0.03125, %v224_v2 }
  0xab   : > { %v227_v4 = vsub.f32 %v807_v0, %v226_v3 }
  0xad   : > { %v228_v5 = vmul.f32 %v227_v4, %v227_v4 }
  0xaf   : > { %v229_v6 = vsel %vm221_vm0, %v228_v5, 0.0 }
  0xb0   : > { %230 = vadd.xlane.f32.xlu0 %v229_v6 }
 0x13d   : > { %v231_v36 = vpop.xlane.xlu0 %230 }
 0x13e   : > { %v232_v37 = vmul.f32 0.03125, %v231_v36 }
 0x140   : > { %v233_v38 = vadd.f32 1e-05, %v232_v37 }
 0x142   : > { %654 = vrsqrt.f32 %v233_v38 }
 0x14c   : > { %v655_v39 = vpop.eup %654 }
 0x14d   : > { %v235_v41 = vmul.f32 %v655_v39, %v227_v4 }
 0x14f   : > { %v241_v43 = vmul.f32 %v505_v40, %v235_v41 }
 0x151   : > { %v247_v44 = vadd.f32 %v506_v42, %v241_v43 }
 0x153   : > { %545 = vmatmul.mubr.msk.f32.vlgmr.msra.gmra.mrb[0].mxu0 %vm221_vm0, %v247_v44 }
 0x226   : > { %v328_v49 = vpop.f32.mrb[0].mxu0 }
 0x227   : > { %v329_v50 = vadd.f32 %v507_v48, %v328_v49  ;;  %v546_v51 = vpop.f32.mrb[1].mxu0 }
 0x229   : > { %v332_v52 = vmax.f32 %v329_v50, 0.0 }
 0x22b   : > { %580 = vmatmul.mubr.f32.vlgmr.msra.gmra.mrb[0].mxu1 %v332_v52 }
 0x2fe   : > { %v420_v54 = vpop.f32.mrb[0].mxu1 }
 0x2ff   : > { %v421_v55 = vadd.f32 %v509_v53, %v420_v54  ;;  %v581_v56 = vpop.f32.mrb[1].mxu1 }
 0x301   : > { %v424_v57 = vadd.f32 %v421_v55, %v807_v0 }
 0x303   : > { %425 = vst.msk [vmem:[%s215_s13] sm:$0xff] %vm221_vm0, %v424_v57 }
 0x304   : > { %669 = shalt.err (!%p666_p3)
}
 0x305   : > { %s670_s6 = scalar_lea.hbm %s892_s17, 128  ;;  %s674_s9 = scalar_lea.hbm %s940_s5, 256 }
 0x306   : > { %p671_p4 = scmp.ne.s32.totalorder %s892_s17, %s670_s6  ;;  %p675_p9 = scmp.lt.u32.totalorder %s892_s17, %s940_s5 }
 0x307   : > { %p676_p10 = scmp.lt.u32.totalorder %s674_s9, %s670_s6  ;;  %p678_p12 = scmp.lt.u32.totalorder %s670_s6, %s892_s17 }
 0x308   : > { %p672_p7 = pnand %p671_p4, %p792_p5 }
 0x309   : > { %p677_p11 = por %p676_p10, %p675_p9 }
 0x30a   : > { %p673_p8 = pneg %p672_p7 }
 0x30b   : > { %p679_p13 = por %p678_p12, %p677_p11 }
 0x30d   : > { %p680_p0 = pnand %p679_p13, %p673_p8 }
 0x30f   : > { %683 = shalt.err (!%p680_p0)
}
 0x310   : > { %612 = dma.vmem_to_hbm [thread:$0]  (%p792_p5), %s894_s14, 128, %s892_s17, %s427_s23  }
 0x311 PF: > { %p618_p1 = scmp.ge.s32.totalorder %s718_s21, 2  ;;  %s452_s12 = sand.u32 1, %s706_s18  }
 0x312   : > { %s453_s13 = scalar_lea.sflag [#allocation3], %s452_s12 }
 0x313   : > { %p615_p2 = pnand %p618_p1, %p796_p6 }
 0x315   : > { %701 = dma.done.wait (!%p615_p2), %s453_s13, 128  }
 0x316   : > { %703 = vsyncadd (!%p615_p2), %s453_s13, 4294967168  ;;  %p15_p3 = scmp.ge.s32.totalorder %s779_s24, 4   ;;  %s943_s18 = smov %s710_s19 }
 0x317   : > { %s944_s19 = smov %s714_s20  ;;  %s945_s20 = smov %s790_s27 }
 0x318   : > { %s946_s21 = smov %s779_s24  ;;  %17 = sbr.rel (!%p15_p3) target bundleno = 3 (0x3), region = 75 }
 0x31f   :  { %458 = vsyncpa [#allocation3], 1 }
 0x320   :  { %460 = vsyncpa [#allocation3 + $0x1], 1 }

</bundles_post_ra>
